<compile_context>
chip_gen: v6e
topology: v6e:2x2x1
jax: 0.10.0
libtpu: 0.0.40
codegen_flags: <defaults>
</compile_context>

<pallas_src>
import functools

import numpy as np
import jax
import jax.numpy as jnp
from jax.experimental import pallas as pl
from jax.experimental.pallas import tpu as pltpu


# ----------------------------------------------------------------------------
# Deterministic parameter initialization (mirrors the PyTorch __init__ math).
# ----------------------------------------------------------------------------
def sample_skew_symmetric_matrix(key, dim):
    num_params = (dim - 1) * dim // 2
    params = jax.random.uniform(key, (num_params,), dtype=jnp.float32)
    mat = jnp.zeros((dim, dim), dtype=jnp.float32)
    iu = jnp.triu_indices(dim, k=1)  # row-major == the torch fill-loop order
    mat = mat.at[iu].set(params)
    return mat - mat.T


def sample_orthogonal_matrix(key, dim):
    return jax.scipy.linalg.expm(sample_skew_symmetric_matrix(key, dim))


def init_stiefel_conv2d_params(key, in_channels, out_channels, kernel_size,
                               use_bias=True):
    k_key, b_key = jax.random.split(key)
    n1 = in_channels * kernel_size ** 2
    n2 = out_channels
    num_rows, num_cols = (n1, n2) if n1 > n2 else (n2, n1)
    q = sample_orthogonal_matrix(k_key, num_rows)[:, :num_cols]
    # Matches torch: kernels.flatten() then .view(OC, IC, K, K)
    w_oihw = q.reshape(-1).reshape(out_channels, in_channels,
                                   kernel_size, kernel_size)
    if use_bias:
        fan_in = in_channels * kernel_size ** 2
        bound = 1.0 / np.sqrt(fan_in)
        b = jax.random.uniform(b_key, (out_channels,), dtype=jnp.float32,
                               minval=-bound, maxval=bound)
    else:
        b = jnp.zeros((out_channels,), dtype=jnp.float32)
    return w_oihw, b


# ----------------------------------------------------------------------------
# Helpers
# ----------------------------------------------------------------------------
def _round_up(x, m):
    return (x + m - 1) // m * m


def _vmem_capacity_bytes():
    """Generation-aware VMEM capacity (falls back to the v7x 64 MiB floor)."""
    try:
        cap = getattr(pltpu.get_tpu_info(), "vmem_capacity_bytes", None)
        if cap:
            return int(cap)
    except Exception:
        pass
    return 64 << 20


def _pick_batch_tile(n, c, oc, k_pad, hw, budget_bytes):
    """Largest batch tile that fits the budget AND keeps >= min(n,4) steps."""
    rup8 = lambda v: _round_up(max(v, 1), 8)
    # f32 bytes per image, counting: double-buffered input block (C padded to
    # a sublane multiple), double-buffered output block, and ~3x K_pad*hw for
    # the transposed patch plus rolled/masked temporaries.
    per_image = 4 * hw * (2 * rup8(c) + 2 * rup8(oc) + 3 * k_pad)
    bt = max(1, min(n, budget_bytes // max(per_image, 1)))
    # Keep at least min(n, 4) grid steps so the pipeline overlaps DMA/compute
    # and megacore (v7x) gets work on both TensorCores.
    bt = min(bt, max(1, n // min(n, 4)))
    while n % bt != 0:
        bt -= 1
    return bt


# ----------------------------------------------------------------------------
# Pallas conv2d kernel: lane-dense transposed im2col + one small GEMM / image.
# ----------------------------------------------------------------------------
def _stiefel_conv2d_kernel(x_ref, w_ref, mask_ref, o_ref, *, bt, c, kh_size,
                           kw_size, pad, img_w, hw, k, k_pad):
    # x_ref:    [bt, C, H*W]     flat NCHW activation tile (lane-dense minor)
    # w_ref:    [OC, K_pad]      im2col weights, bias folded in at column K
    # mask_ref: [KH*KW, H*W]     per-offset validity masks (implicit zero pad)
    # o_ref:    [bt, OC, H*W]    output, already in final NC(H*W) layout
    x = x_ref[...]
    masks = mask_ref[...]

    parts = []
    for kh in range(kh_size):
        for kw in range(kw_size):
            dh, dw = kh - pad, kw - pad
            off = dh * img_w + dw
            # part[p] = x[p + off] (flat plane), zeroed where (row+dh, col+dw)
            # falls outside the image -> implicit zero padding, no scratch.
            shifted = x if off == 0 else pltpu.roll(x, shift=(-off) % hw, axis=2)
            parts.append(shifted * masks[kh * kw_size + kw])
    parts.append(jnp.ones((bt, 1, hw), x.dtype))           # bias "ones" row
    if k_pad > k + 1:
        parts.append(jnp.zeros((bt, k_pad - k - 1, hw), x.dtype))

    patch_t = jnp.concatenate(parts, axis=1)                # [bt, K_pad, H*W]
    wmat = w_ref[...]                                       # [OC, K_pad]

    for b in range(bt):                                     # bt is small/static
        acc = jnp.dot(wmat, patch_t[b], preferred_element_type=jnp.float32)
        o_ref[b] = acc.astype(o_ref.dtype)                  # [OC, H*W]


def stiefel_conv2d(x_nchw, w_oihw, bias, *, stride=1, padding=0, use_bias=True):
    N, C, H, W = x_nchw.shape
    OC, IC, KH, KW = w_oihw.shape
    assert IC == C
    if stride != 1:
        # TODO(synk): stride > 1 needs decimation at DMA time (pl.ds stride /
        # index_map); only the module-default stride == 1 path is implemented.
        raise NotImplementedError("StiefelConv2d Pallas kernel: stride > 1")
    OH = H + 2 * padding - KH + 1
    OW = W + 2 * padding - KW + 1
    assert 0 < OH <= H and 0 < OW <= W, (
        "TODO(synk): padding > (kernel_size - 1) // 2 not supported")

    P = H * W
    K = KH * KW * C
    K_pad = _round_up(K + 1, 8)          # +1 for the bias "ones" row

    # Free reshape: NCHW stays put, H*W becomes the lane-dense minor dim.
    x = x_nchw.reshape(N, C, P).astype(jnp.float32)

    # Weights: [OC, IC, KH, KW] -> [OC, K_pad] with column order (kh, kw, c);
    # bias folded in as column K; pad columns zero.
    w2 = jnp.transpose(w_oihw, (0, 2, 3, 1)).reshape(OC, K).astype(jnp.float32)
    w_full = jnp.zeros((OC, K_pad), jnp.float32).at[:, :K].set(w2)
    if use_bias:
        w_full = w_full.at[:, K].set(bias.astype(jnp.float32))

    # Per-(kh, kw) validity masks over the flat H*W grid, precomputed once on
    # the host (no per-step iota/compare/zero-fill work in the kernel).
    mask_np = np.zeros((KH * KW, H, W), np.float32)
    for kh in range(KH):
        for kw in range(KW):
            dh, dw = kh - padding, kw - padding
            r0, r1 = max(0, -dh), min(H, H - dh)
            c0, c1 = max(0, -dw), min(W, W - dw)
            mask_np[kh * KW + kw, r0:r1, c0:c1] = 1.0
    masks = jnp.asarray(mask_np.reshape(KH * KW, P))

    vmem_cap = _vmem_capacity_bytes()
    vmem_limit = min(vmem_cap * 3 // 4, 64 << 20)   # <= 48 MiB on v7x (64 MiB)
    bt = _pick_batch_tile(N, C, OC, K_pad, P, vmem_limit // 2)

    kernel = functools.partial(
        _stiefel_conv2d_kernel, bt=bt, c=C, kh_size=KH, kw_size=KW,
        pad=padding, img_w=W, hw=P, k=K, k_pad=K_pad)

    out_flat = pl.pallas_call(
        kernel,
        out_shape=jax.ShapeDtypeStruct((N, OC, P), jnp.float32),
        grid=(N // bt,),
        in_specs=[
            pl.BlockSpec((bt, C, P), lambda n: (n, 0, 0)),
            pl.BlockSpec((OC, K_pad), lambda n: (0, 0)),
            pl.BlockSpec((KH * KW, P), lambda n: (0, 0)),
        ],
        out_specs=pl.BlockSpec((bt, OC, P), lambda n: (n, 0, 0)),
        compiler_params=pltpu.CompilerParams(
            dimension_semantics=("parallel",),
            vmem_limit_bytes=vmem_limit),
    )(x, w_full, masks)

    out = out_flat.reshape(N, OC, H, W)            # free layout reshape
    if OH != H or OW != W:
        out = out[:, :, :OH, :OW]                  # non-"same" conv: trim edges
    return out.astype(x_nchw.dtype)


# ----------------------------------------------------------------------------
# Demo / self-check
# ----------------------------------------------------------------------------
if __name__ == "__main__":
    in_channels, out_channels, kernel_size = 4, 8, 3
    stride, padding = 1, 1
    N, H, W = 2, 16, 16

    key = jax.random.PRNGKey(0)
    p_key, x_key = jax.random.split(key)

    w_oihw, bias = init_stiefel_conv2d_params(
        p_key, in_channels, out_channels, kernel_size, use_bias=True)
    x = jax.random.normal(x_key, (N, in_channels, H, W), dtype=jnp.float32)

    out = stiefel_conv2d(x, w_oihw, bias, stride=stride, padding=padding,
                         use_bias=True)
    out = jax.block_until_ready(out)

    # Reference: XLA conv2d with identical semantics.
    ref = jax.lax.conv_general_dilated(
        x, w_oihw, window_strides=(stride, stride),
        padding=[(padding, padding), (padding, padding)],
        dimension_numbers=("NCHW", "OIHW", "NCHW"))
    ref = ref + bias[None, :, None, None]
    ref = jax.block_until_ready(ref)

    assert out.shape == (N, out_channels, H, W)
    np.testing.assert_allclose(np.asarray(out), np.asarray(ref),
                               rtol=1e-4, atol=1e-4)
    print("KERNEL_OK")
</pallas_src>

<mosaic_0001>
module attributes {stable_mosaic.version = 11 : i64} {
  func.func @_stiefel_conv2d_kernel(%arg0: i32, %arg1: memref<1x4x256xf32, #tpu.memory_space<vmem>>, %arg2: memref<8x40xf32, #tpu.memory_space<vmem>>, %arg3: memref<9x256xf32, #tpu.memory_space<vmem>>, %arg4: memref<1x8x256xf32, #tpu.memory_space<vmem>>) attributes {dimension_semantics = [#tpu.dimension_semantics<parallel>], iteration_bounds = array<i64: 2>, scalar_prefetch = 0 : i64, scratch_operands = 0 : i64, tpu.core_type = #tpu.core_type<tc>, window_params = [{transform_indices = @transform_0, window_bounds = array<i64: 1, 4, 256>}, {pipeline_mode = #tpu.pipeline_mode<synchronous>, transform_indices = @transform_1, window_bounds = array<i64: 8, 40>}, {pipeline_mode = #tpu.pipeline_mode<synchronous>, transform_indices = @transform_2, window_bounds = array<i64: 9, 256>}, {transform_indices = @transform_3, window_bounds = array<i64: 1, 8, 256>}]} {
    %c0 = arith.constant 0 : index
    %c0_0 = arith.constant 0 : index
    %c0_1 = arith.constant 0 : index
    %0 = vector.load %arg1[%c0, %c0_0, %c0_1] : memref<1x4x256xf32, #tpu.memory_space<vmem>>, vector<1x4x256xf32>
    %c0_2 = arith.constant 0 : index
    %c0_3 = arith.constant 0 : index
    %1 = vector.load %arg3[%c0_2, %c0_3] : memref<9x256xf32, #tpu.memory_space<vmem>>, vector<9x256xf32>
    %c17_i32 = arith.constant 17 : i32
    %2 = tpu.dynamic_rotate %0 by %c17_i32 dim 2 : vector<1x4x256xf32>, i32 -> vector<1x4x256xf32>
    %3 = vector.extract_strided_slice %1 {offsets = [0, 0], sizes = [1, 256], strides = [1, 1]} : vector<9x256xf32> to vector<1x256xf32>
    %4 = vector.shape_cast %3 : vector<1x256xf32> to vector<256xf32>
    %5 = vector.shape_cast %4 : vector<256xf32> to vector<1x1x256xf32>
    %6 = vector.broadcast %5 : vector<1x1x256xf32> to vector<1x4x256xf32>
    %7 = arith.mulf %2, %6 : vector<1x4x256xf32>
    %c16_i32 = arith.constant 16 : i32
    %8 = tpu.dynamic_rotate %0 by %c16_i32 dim 2 : vector<1x4x256xf32>, i32 -> vector<1x4x256xf32>
    %9 = vector.extract_strided_slice %1 {offsets = [1, 0], sizes = [1, 256], strides = [1, 1]} : vector<9x256xf32> to vector<1x256xf32>
    %10 = vector.shape_cast %9 : vector<1x256xf32> to vector<256xf32>
    %11 = vector.shape_cast %10 : vector<256xf32> to vector<1x1x256xf32>
    %12 = vector.broadcast %11 : vector<1x1x256xf32> to vector<1x4x256xf32>
    %13 = arith.mulf %8, %12 : vector<1x4x256xf32>
    %c15_i32 = arith.constant 15 : i32
    %14 = tpu.dynamic_rotate %0 by %c15_i32 dim 2 : vector<1x4x256xf32>, i32 -> vector<1x4x256xf32>
    %15 = vector.extract_strided_slice %1 {offsets = [2, 0], sizes = [1, 256], strides = [1, 1]} : vector<9x256xf32> to vector<1x256xf32>
    %16 = vector.shape_cast %15 : vector<1x256xf32> to vector<256xf32>
    %17 = vector.shape_cast %16 : vector<256xf32> to vector<1x1x256xf32>
    %18 = vector.broadcast %17 : vector<1x1x256xf32> to vector<1x4x256xf32>
    %19 = arith.mulf %14, %18 : vector<1x4x256xf32>
    %c1_i32 = arith.constant 1 : i32
    %20 = tpu.dynamic_rotate %0 by %c1_i32 dim 2 : vector<1x4x256xf32>, i32 -> vector<1x4x256xf32>
    %21 = vector.extract_strided_slice %1 {offsets = [3, 0], sizes = [1, 256], strides = [1, 1]} : vector<9x256xf32> to vector<1x256xf32>
    %22 = vector.shape_cast %21 : vector<1x256xf32> to vector<256xf32>
    %23 = vector.shape_cast %22 : vector<256xf32> to vector<1x1x256xf32>
    %24 = vector.broadcast %23 : vector<1x1x256xf32> to vector<1x4x256xf32>
    %25 = arith.mulf %20, %24 : vector<1x4x256xf32>
    %26 = vector.extract_strided_slice %1 {offsets = [4, 0], sizes = [1, 256], strides = [1, 1]} : vector<9x256xf32> to vector<1x256xf32>
    %27 = vector.shape_cast %26 : vector<1x256xf32> to vector<256xf32>
    %28 = vector.shape_cast %27 : vector<256xf32> to vector<1x1x256xf32>
    %29 = vector.broadcast %28 : vector<1x1x256xf32> to vector<1x4x256xf32>
    %30 = arith.mulf %0, %29 : vector<1x4x256xf32>
    %c255_i32 = arith.constant 255 : i32
    %31 = tpu.dynamic_rotate %0 by %c255_i32 dim 2 : vector<1x4x256xf32>, i32 -> vector<1x4x256xf32>
    %32 = vector.extract_strided_slice %1 {offsets = [5, 0], sizes = [1, 256], strides = [1, 1]} : vector<9x256xf32> to vector<1x256xf32>
    %33 = vector.shape_cast %32 : vector<1x256xf32> to vector<256xf32>
    %34 = vector.shape_cast %33 : vector<256xf32> to vector<1x1x256xf32>
    %35 = vector.broadcast %34 : vector<1x1x256xf32> to vector<1x4x256xf32>
    %36 = arith.mulf %31, %35 : vector<1x4x256xf32>
    %c241_i32 = arith.constant 241 : i32
    %37 = tpu.dynamic_rotate %0 by %c241_i32 dim 2 : vector<1x4x256xf32>, i32 -> vector<1x4x256xf32>
    %38 = vector.extract_strided_slice %1 {offsets = [6, 0], sizes = [1, 256], strides = [1, 1]} : vector<9x256xf32> to vector<1x256xf32>
    %39 = vector.shape_cast %38 : vector<1x256xf32> to vector<256xf32>
    %40 = vector.shape_cast %39 : vector<256xf32> to vector<1x1x256xf32>
    %41 = vector.broadcast %40 : vector<1x1x256xf32> to vector<1x4x256xf32>
    %42 = arith.mulf %37, %41 : vector<1x4x256xf32>
    %c240_i32 = arith.constant 240 : i32
    %43 = tpu.dynamic_rotate %0 by %c240_i32 dim 2 : vector<1x4x256xf32>, i32 -> vector<1x4x256xf32>
    %44 = vector.extract_strided_slice %1 {offsets = [7, 0], sizes = [1, 256], strides = [1, 1]} : vector<9x256xf32> to vector<1x256xf32>
    %45 = vector.shape_cast %44 : vector<1x256xf32> to vector<256xf32>
    %46 = vector.shape_cast %45 : vector<256xf32> to vector<1x1x256xf32>
    %47 = vector.broadcast %46 : vector<1x1x256xf32> to vector<1x4x256xf32>
    %48 = arith.mulf %43, %47 : vector<1x4x256xf32>
    %c239_i32 = arith.constant 239 : i32
    %49 = tpu.dynamic_rotate %0 by %c239_i32 dim 2 : vector<1x4x256xf32>, i32 -> vector<1x4x256xf32>
    %50 = vector.extract_strided_slice %1 {offsets = [8, 0], sizes = [1, 256], strides = [1, 1]} : vector<9x256xf32> to vector<1x256xf32>
    %51 = vector.shape_cast %50 : vector<1x256xf32> to vector<256xf32>
    %52 = vector.shape_cast %51 : vector<256xf32> to vector<1x1x256xf32>
    %53 = vector.broadcast %52 : vector<1x1x256xf32> to vector<1x4x256xf32>
    %54 = arith.mulf %49, %53 : vector<1x4x256xf32>
    %cst = arith.constant 1.000000e+00 : f32
    %55 = vector.broadcast %cst : f32 to vector<1x1x256xf32>
    %cst_4 = arith.constant 0.000000e+00 : f32
    %56 = vector.broadcast %cst_4 : f32 to vector<1x3x256xf32>
    %57 = tpu.concatenate %7, %13, %19, %25, %30, %36, %42, %48, %54, %55, %56 in 1 : vector<1x4x256xf32>, vector<1x4x256xf32>, vector<1x4x256xf32>, vector<1x4x256xf32>, vector<1x4x256xf32>, vector<1x4x256xf32>, vector<1x4x256xf32>, vector<1x4x256xf32>, vector<1x4x256xf32>, vector<1x1x256xf32>, vector<1x3x256xf32> -> vector<1x40x256xf32>
    %c0_5 = arith.constant 0 : index
    %c0_6 = arith.constant 0 : index
    %58 = vector.load %arg2[%c0_5, %c0_6] : memref<8x40xf32, #tpu.memory_space<vmem>>, vector<8x40xf32>
    %59 = vector.shape_cast %57 : vector<1x40x256xf32> to vector<40x256xf32>
    %cst_7 = arith.constant dense<0.000000e+00> : vector<8x256xf32>
    %60 = tpu.matmul %58, %59, %cst_7 {dimension_numbers = #tpu.dot_dimension_numbers<[1], [0], [0], [1], [0, 0, 1, 1], [], []>} : vector<8x40xf32>, vector<40x256xf32>, vector<8x256xf32> -> vector<8x256xf32>
    %c0_8 = arith.constant 0 : index
    %c0_9 = arith.constant 0 : index
    %c0_10 = arith.constant 0 : index
    %61 = vector.load %arg4[%c0_8, %c0_9, %c0_10] : memref<1x8x256xf32, #tpu.memory_space<vmem>>, vector<1x8x256xf32>
    %62 = vector.shape_cast %61 : vector<1x8x256xf32> to vector<8x256xf32>
    %63 = vector.shape_cast %60 : vector<8x256xf32> to vector<1x8x256xf32>
    tpu.vector_store %arg4[%c0_8, %c0_9, %c0_10], %63 {strides = array<i32>} : memref<1x8x256xf32, #tpu.memory_space<vmem>>, vector<1x8x256xf32>,
    return
  }
  func.func @transform_0(%arg0: i32) -> (i32, i32, i32) {
    %c0_i32 = arith.constant 0 : i32
    %c0_i32_0 = arith.constant 0 : i32
    %c0_i32_1 = arith.constant 0 : i32
    return %arg0, %c0_i32, %c0_i32_0 : i32, i32, i32
  }
  func.func @transform_1(%arg0: i32) -> (i32, i32) {
    %c0_i32 = arith.constant 0 : i32
    %c0_i32_0 = arith.constant 0 : i32
    %c0_i32_1 = arith.constant 0 : i32
    return %c0_i32, %c0_i32_0 : i32, i32
  }
  func.func @transform_2(%arg0: i32) -> (i32, i32) {
    %c0_i32 = arith.constant 0 : i32
    %c0_i32_0 = arith.constant 0 : i32
    %c0_i32_1 = arith.constant 0 : i32
    return %c0_i32, %c0_i32_0 : i32, i32
  }
  func.func @transform_3(%arg0: i32) -> (i32, i32, i32) {
    %c0_i32 = arith.constant 0 : i32
    %c0_i32_0 = arith.constant 0 : i32
    %c0_i32_1 = arith.constant 0 : i32
    return %arg0, %c0_i32, %c0_i32_0 : i32, i32, i32
  }
}

</mosaic_0001>

<bundles_post_ra>
// kernel: tpu_custom_call.1
= control target key start
LH: loop header
LB: loop body
LE: loop exit
PB: predicated region body
PF: predicated region fallthrough
CT: control target
= control target key end

     0   :  { %8 = vsyncpa [#allocation3], 0  ;;  %s1138_s0 = inlined_call_operand.hbm [shape: f32[2,4,256], index: 0, kind: input, shape index: {}]   ;;  %s1139_s1 = inlined_call_operand.hbm [shape: f32[8,40], index: 1, kind: input, shape index: {}]   ;;  %s1140_s2 = inlined_call_operand.hbm [shape: f32[9,256], index: 2, kind: input, shape index: {}]   ;;  %s1141_s3 = inlined_call_operand.hbm [shape: f32[2,8,256], index: 3, kind: output, shape index: {}]  }
   0x1   :  { %10 = vsyncpa [#allocation3 + $0x1], 0 }
   0x2   :  { %11 = vsyncpa [#allocation6], 0 }
   0x3   :  { %12 = vsyncpa [#allocation4], 0 }
   0x4   :  { %14 = vsyncpa [#allocation4 + $0x1], 0  ;;  %s885_s12 = smov 0   ;;  %s887_s13 = smov 0  }
   0x5   :  { %s889_s14 = smov 0   ;;  %s891_s15 = smov 0  }
   0x6 LB: > { %s906_s16 = sadd.s32 4294967295, %s848_s15   ;;  %s596_s17 = sadd.s32 4294967294, %s848_s15   ;;  %s848_s15 = sphi %s891_s15, %s1163_s15   ;;  %s844_s14 = sphi %s889_s14, %s1162_s14   ;;  %s840_s13 = sphi %s887_s13, %s1161_s13   ;;  %s836_s12 = sphi %s885_s12, %s1160_s12  }
   0x7   : > { %p40_p0 = scmp.ne.s32.totalorder %s840_s13, %s836_s12  ;;  %p1142_p1 = scmp.eq.s32.totalorder %s906_s16, 0 }
   0x8   : > { %p112_p3 = scmp.eq.s32.totalorder %s596_s17, 1  ;;  %p597_p5 = scmp.ge.s32.totalorder %s848_s15, 1 }
   0x9   : > { %p915_p4 = por %p1142_p1, %p40_p0  ;;  %p119_p7 = scmp.lt.s32.totalorder %s848_s15, 3 }
   0xa   : > { %p920_p6 = por %p112_p3, %p40_p0  ;;  %s850_s21 = smov [#allocation5]  }
   0xb   : > { %s1146_s18 = scalar_select %p915_p4, 1, 0 }
   0xc   : > { %s1147_s19 = scalar_select %p920_p6, 1, 0 }
   0xd   : > { %p925_p8 = pnand %p597_p5, %p119_p7  ;;  %s132_s22 = sshll.u32 %s850_s21, 4  ;;  %s133_s22 = int_to_ptr.vmem [resolvable:$true] %s132_s22 }
   0xe   : > { %s851_s23 = smov [#allocation7]   ;;  %s711_s26 = scalar_lea.vmem %s133_s22, 128 }
   0xf   : > { %s1148_s20 = scalar_select %p925_p8, 1, 0 }
  0x10   : > { %p633_p10 = pneg %p925_p8  ;;  %s142_s24 = sshll.u32 %s851_s23, 4  ;;  %s143_s24 = int_to_ptr.vmem [resolvable:$true] %s142_s24 }
  0x11   : > { %p712_p13 = scmp.ne.s32.totalorder %s133_s22, %s711_s26  ;;  %p719_p5 = scmp.lt.s32.totalorder %s133_s22, %s133_s22 }
  0x12   : > { %p934_p11 = pnand %p633_p10, %p1142_p1  ;;  %p720_p7 = scmp.lt.s32.totalorder %s711_s26, %s711_s26 }
  0x14   : > { %p702_p12 = pneg %p934_p11  ;;  %p721_p9 = por %p720_p7, %p719_p5 }
  0x16   : > { %p714_p0 = pnand %p712_p13, %p702_p12 }
  0x18   : > { %p715_p3 = pneg %p714_p0 }
  0x1a   : > { %p722_p2 = pnand %p721_p9, %p715_p3 }
  0x1c   : > { %725 = shalt.err (!%p722_p2)
}
  0x1d   : > { %636 = dma.hbm_to_vmem [thread:$0]  (!%p934_p11), %s1139_s1, 128, %s133_s22, [#allocation6]  }
  0x1e   : > { %s737_s29 = scalar_lea.vmem %s143_s24, 512  ;;  %p745_p13 = scmp.lt.s32.totalorder %s143_s24, %s143_s24 }
  0x1f   : > { %p738_p10 = scmp.ne.s32.totalorder %s143_s24, %s737_s29  ;;  %p746_p0 = scmp.lt.s32.totalorder %s737_s29, %s737_s29 }
  0x21   : > { %p740_p1 = pnand %p738_p10, %p702_p12  ;;  %p747_p4 = por %p746_p0, %p745_p13 }
  0x23   : > { %p741_p6 = pneg %p740_p1 }
  0x25   : > { %p748_p8 = pnand %p747_p4, %p741_p6 }
  0x27   : > { %751 = shalt.err (!%p748_p8)
}
  0x28   : > { %s852_s30 = smov 256   ;;  %s853_s4 = smov 16  }
  0x29   : > { %639 = dma.hbm_to_vmem [thread:$0]  (!%p934_p11), %s1140_s2, 512, %s143_s24, [#allocation6], %s852_s30, %s852_s30, %s853_s4  }
  0x2a   : > { %s957_s7 = sadd.s32 1, %s848_s15   ;;  %s27_s8 = sadd.s32 1, %s844_s14 }
  0x2b   : > { %s24_s9 = ssub.s32 %s848_s15, %s957_s7  ;;  %p34_p1 = scmp.ne.s32.totalorder %s844_s14, %s840_s13 }
  0x2c   : > { %p25_p2 = scmp.eq.s32.totalorder %s24_s9, 0  ;;  %p35_p4 = scmp.eq.s32.totalorder %s848_s15, 0 }
  0x2d   : > { %p1150_p6 = scmp.eq.s32.totalorder %s906_s16, 1  ;;  %p650_p9 = scmp.lt.s32.totalorder %s848_s15, 2 }
  0x2e   : > { %s973_s11 = scalar_select %p25_p2, %s844_s14, %s27_s8  }
  0x2f   : > { %p967_p8 = por %p1150_p6, %p34_p1  ;;  %p36_p12 = por %p35_p4, %p34_p1 }
  0x30   : > { %s156_s17 = sand.u32 1, %s844_s14   ;;  %s619_s22 = sshll.u32 %s848_s15, 7 }
  0x31   : > { %s1151_s10 = scalar_select %p967_p8, 1, 0 }
  0x32   : > { %s601_s21 = sshll.u32 %s156_s17, 3  ;;  %s980_s25 = scalar_lea.hbm %s1138_s0, %s619_s22 }
  0x33   : > { %s160_s26 = scalar_lea.vmem [#allocation2], %s601_s21  ;;  %p982_p11 = pnand %p650_p9, %p36_p12 }
  0x34   : > { %s168_s27 = sshll.u32 %s160_s26, 4  ;;  %s157_s29 = scalar_lea.sflag [#allocation3], %s156_s17  ;;  %s169_s27 = int_to_ptr.vmem [resolvable:$true] %s168_s27 }
  0x35   : > { %s752_s30 = scalar_lea.hbm %s980_s25, 128  ;;  %p754_p5 = pneg %p982_p11 }
  0x36   : > { %p753_p3 = scmp.ne.s32.totalorder %s980_s25, %s752_s30  ;;  %s757_s6 = scalar_lea.hbm %s1138_s0, 256 }
  0x37   : > { %p758_p13 = scmp.lt.s32.totalorder %s980_s25, %s1138_s0  ;;  %p759_p0 = scmp.lt.s32.totalorder %s757_s6, %s752_s30 }
  0x38   : > { %p755_p7 = pnand %p754_p5, %p753_p3 }
  0x39   : > { %p760_p1 = por %p759_p0, %p758_p13 }
  0x3a   : > { %p756_p10 = pneg %p755_p7 }
  0x3c   : > { %p761_p2 = pnand %p760_p1, %p756_p10 }
  0x3e   : > { %764 = shalt.err (!%p761_p2)
}
  0x3f   : > { %s765_s21 = scalar_lea.vmem %s169_s27, 128  ;;  %s854_s17 = smov [#allocation2]  }
  0x40   : > { %p766_p4 = scmp.ne.s32.totalorder %s169_s27, %s765_s21  ;;  %s770_s22 = sshll.u32 %s854_s17, 4  ;;  %s771_s22 = int_to_ptr.vmem [resolvable:$false] %s770_s22 }
  0x41   : > { %s772_s23 = scalar_lea.vmem %s771_s22, 256  ;;  %p773_p12 = scmp.lt.s32.totalorder %s169_s27, %s771_s22 }
  0x42   : > { %p768_p6 = pnand %p766_p4, %p754_p5  ;;  %p774_p3 = scmp.lt.s32.totalorder %s772_s23, %s765_s21 }
  0x44   : > { %p769_p9 = pneg %p768_p6  ;;  %p775_p7 = por %p774_p3, %p773_p12 }
  0x46   : > { %p776_p8 = pnand %p775_p7, %p769_p9 }
  0x48   : > { %779 = shalt.err (!%p776_p8)
}
  0x49   : > { %643 = dma.hbm_to_vmem [thread:$0]  (!%p982_p11), %s980_s25, 128, %s169_s27, %s157_s29  }
  0x4a   : > { %p1153_p10 = scmp.ne.s32.totalorder %s1148_s20, 0 }
  0x4b   : > { %s1003_s24 = sand.u32 (!%p1153_p10), 1, %s840_s13   ;;  %p1154_p5 = scmp.ne.s32.totalorder (!%p1153_p10), %s1146_s18, 0 }
  0x4c   : > { %177 = sbr.rel (%p1153_p10) target bundleno = 443 (0x1bb), region = 32  ;;  %s605_s26 = sshll.u32 (!%p1153_p10), %s1003_s24, 3 }
  0x4d   : > { %s180_s30 = scalar_lea.sflag (!%p1153_p10), [#allocation3], %s1003_s24  ;;  %s183_s4 = scalar_lea.vmem (!%p1153_p10), [#allocation2], %s605_s26 }
  0x51   : > { %823 = dma.done.wait (%p1154_p5), %s180_s30, 128  }
  0x52   : > { %825 = vsyncadd (%p1154_p5), %s180_s30, 4294967168  ;;  %p1155_p8 = scmp.eq.s32.totalorder %s906_s16, 0 }
  0x54   : > { %827 = dma.done.wait (%p1155_p8), [#allocation6], 640   ;;  %p1156_p11 = pmov %p1155_p8 }
  0x55   : > { %v1015_v0 = vld [vmem:[%s183_s4] sm:$0xff]  ;;  %s855_s20 = smov 111   ;;  %s856_s25 = smov 112   ;;  %v861_v2 = vmov 0.0   ;;  %v226_v3 = vlaneseq  ;;  %v1030_v6 = vld [vmem:[#allocation7] sm:$0xff]  ;;  %vm400_vm1 = vcmask 1043456  }
  0x56   : > { %829 = vsyncadd (%p1156_p11), [#allocation6], 4294966656  ;;  %356 = vrot.lane.b32.xlu1 %v1015_v0, %s855_s20  ;;  %339 = vrot.lane.b32.xlu0 %v1015_v0, %s856_s25  ;;  %v220_v1 = vcombine.high %v1015_v0, %v1015_v0  ;;  %s857_s27 = smov 127   ;;  %s858_s18 = smov 113   ;;  %v1032_v7 = vld [vmem:[#allocation7 + $0x8] sm:$0xff]  ;;  %vm411_vm3 = vcmask 1044480  }
  0x57   : > { %s859_s28 = smov 1   ;;  %s860_s29 = smov 16   ;;  %483 = vmatprep.mubr.f32.mxu0 %v861_v2  ;;  %v1027_v4 = vshrl.u32 %v226_v3, 7  ;;  %v1034_v8 = vand.u32 127, %v226_v3  ;;  %v609_v15 = vld [vmem:[#allocation7 + $0x10] ss:$0 sm:$0xff] }
  0x58   : > { %s862_s5 = smov 15   ;;  %s863_s6 = smov 17   ;;  %v610_v16 = vld [vmem:[#allocation7 + $0x18] ss:$0 sm:$0xff]  ;;  %vm415_vm10 = vcmask 326656  }
  0x59   : > { %v294_v5 = vsub.s32 4, %v1027_v4  ;;  %v348_v13 = vsub.s32 7, %v1027_v4  ;;  %vm360_vm0 = vcmp.lt.s32.totalorder %v1034_v8, 111  ;;  %v314_v14 = vsub.s32 5, %v1027_v4  ;;  %s608_s8 = sshll.u32 %s1003_s24, 4  ;;  %s620_s17 = sshll.u32 %s906_s16, 8 }
  0x5a   : > { %305 = vrot.lane.b32.xlu0 %v1015_v0, %s857_s27  ;;  %358 = vrot.lane.b32.xlu1 %v220_v1, %s855_s20  ;;  %vm309_vm2 = vcmp.lt.s32.totalorder %v1034_v8, 127  ;;  %v331_v19 = vsub.s32 6, %v1027_v4  ;;  %vm343_vm4 = vcmp.lt.s32.totalorder %v1034_v8, 112  ;;  %vm326_vm5 = vcmp.lt.s32.totalorder %v1034_v8, 113  ;;  %s213_s9 = scalar_lea.vmem [#allocation8], %s608_s8  ;;  %s505_s26 = scalar_lea.hbm %s1141_s3, %s620_s17 }
  0x5b   : > { %v295_v11 = vrot.slane %v1030_v6, %v294_v5  ;;  %v299_v12 = vrot.slane %v1032_v7, %v294_v5  ;;  %v349_v23 = vrot.slane %v1030_v6, %v348_v13  ;;  %v319_v25 = vrot.slane %v1032_v7, %v314_v14  ;;  %s507_s21 = sshll.u32 %s213_s9, 4  ;;  %s493_s30 = scalar_lea.sflag [#allocation4], %s1003_s24  ;;  %s1098_s21 = int_to_ptr.vmem [resolvable:$true] %s507_s21 }
  0x5c   : > { %v353_v26 = vrot.slane %v1032_v7, %v348_v13  ;;  %v315_v28 = vrot.slane %v1030_v6, %v314_v14  ;;  %v332_v33 = vrot.slane %v1030_v6, %v331_v19  ;;  %v336_v42 = vrot.slane %v1032_v7, %v331_v19  ;;  %s780_s4 = scalar_lea.vmem %s1098_s21, 256  ;;  %p1157_p0 = scmp.ne.s32.totalorder %s1151_s10, 0 }
  0x5d   : > { %v302_v20 = vcombine.low %v295_v11, %v299_v12  ;;  %v284_v46 = vsub.s32 3, %v1027_v4  ;;  %vm279_vm6 = vcmp.lt.s32.totalorder %v1034_v8, 1  ;;  %v250_v62 = vsub.s32 1, %v1027_v4  ;;  %p781_p13 = scmp.ne.s32.totalorder %s1098_s21, %s780_s4  ;;  %s864_s16 = smov [#allocation8]  }
  0x5e   : > { %307 = vrot.lane.b32.xlu1 %v220_v1, %s857_s27  ;;  %341 = vrot.lane.b32.xlu0 %v220_v1, %s856_s25  ;;  %v267_v2 = vsub.s32 2, %v1027_v4  ;;  %vm245_vm7 = vcmp.lt.s32.totalorder %v1034_v8, 16  ;;  %vm262_vm8 = vcmp.lt.s32.totalorder %v1034_v8, 15  ;;  %vm228_vm9 = vcmp.lt.s32.totalorder %v1034_v8, 17  ;;  %s784_s20 = sshll.u32 %s864_s16, 4  ;;  %s785_s20 = int_to_ptr.vmem [resolvable:$false] %s784_s20 }
  0x5f   : > { %v304_v34 = vmul.f32 %v302_v20, %v1015_v0  ;;  %v285_v60 = vrot.slane %v1030_v6, %v284_v46  ;;  %v289_v61 = vrot.slane %v1032_v7, %v284_v46  ;;  %v251_v13 = vrot.slane %v1030_v6, %v250_v62  ;;  %p782_p1 = pnand %p781_p13, %p1157_p0  ;;  %s786_s25 = scalar_lea.vmem %s785_s20, 512 }
  0x60   : > { %v255_v14 = vrot.slane %v1032_v7, %v250_v62  ;;  %p787_p4 = scmp.lt.s32.totalorder %s1098_s21, %s785_s20  ;;  %p788_p6 = scmp.lt.s32.totalorder %s786_s25, %s780_s4 }
  0x61   : > { %v386_v50 = vcombine.high %v304_v34, %v304_v34  ;;  %p783_p2 = pneg %p782_p1 }
  0x62   : > { %324 = vrot.lane.b32.xlu1 %v220_v1, %s858_s18  ;;  %322 = vrot.lane.b32.xlu0 %v1015_v0, %s858_s18  ;;  %p789_p9 = por %p788_p6, %p787_p4 }
  0x64   : > { %p790_p12 = pnand %p789_p9, %p783_p2 }
  0x66   : > { %277 = vrot.lane.b32.xlu1 %v220_v1, %s859_s28  ;;  %275 = vrot.lane.b32.xlu0 %v1015_v0, %s859_s28 }
  0x6a   : > { %243 = vrot.lane.b32.xlu1 %v220_v1, %s860_s29  ;;  %241 = vrot.lane.b32.xlu0 %v1015_v0, %s860_s29 }
  0x6e   : > { %260 = vrot.lane.b32.xlu1 %v220_v1, %s862_s5  ;;  %258 = vrot.lane.b32.xlu0 %v1015_v0, %s862_s5 }
  0x72   : > { %224 = vrot.lane.b32.xlu1 %v220_v1, %s863_s6  ;;  %222 = vrot.lane.b32.xlu0 %v1015_v0, %s863_s6 }
  0xc8   : > { %v357_v9 = vpop.permute.xlu1 %356  ;;  %v340_v10 = vpop.permute.xlu0 %339 }
  0xcc   : > { %v306_v17 = vpop.permute.xlu0 %305  ;;  %v359_v18 = vpop.permute.xlu1 %358 }
  0xcd   : > { %v361_v21 = vsel %vm360_vm0, %v357_v9, %v359_v18  ;;  %v362_v22 = vsel %vm360_vm0, %v359_v18, %v357_v9 }
  0xce   : > { %v371_v24 = vmul.f32 %v609_v15, %v361_v21  ;;  %v372_v27 = vmul.f32 %v610_v16, %v362_v22  ;;  %v268_v15 = vrot.slane %v1030_v6, %v267_v2  ;;  %v272_v16 = vrot.slane %v1032_v7, %v267_v2 }
  0xd0   : > { %v308_v29 = vpop.permute.xlu1 %307  ;;  %v342_v30 = vpop.permute.xlu0 %341  ;;  %v410_v31 = vsel %vm400_vm1, %v372_v27, 1.0  ;;  %v409_v32 = vsel %vm400_vm1, %v371_v24, 1.0 }
  0xd1   : > { %v310_v35 = vsel %vm309_vm2, %v306_v17, %v308_v29  ;;  %v311_v36 = vsel %vm309_vm2, %v308_v29, %v306_v17  ;;  %v344_v37 = vsel %vm343_vm4, %v340_v10, %v342_v30  ;;  %v345_v38 = vsel %vm343_vm4, %v342_v30, %v340_v10  ;;  %611 = vmatprep.subr.msk.mxu0 %vm411_vm3, %v410_v31 }
  0xd2   : > { %v321_v39 = vmul.f32 %v319_v25, %v311_v36  ;;  %v354_v40 = vmul.f32 %v349_v23, %v344_v37  ;;  %v355_v41 = vmul.f32 %v353_v26, %v345_v38  ;;  %612 = vmatpush1.msk.msra.mxu0 %vm411_vm3, %v409_v32  ;;  %v320_v43 = vmul.f32 %v315_v28, %v310_v35 }
  0xd3   : > { %v233_v10 = vsub.s32 0, %v1027_v4 }
  0xd4   : > { %v325_v44 = vpop.permute.xlu1 %324  ;;  %v323_v45 = vpop.permute.xlu0 %322  ;;  %v391_v47 = vrot.slane %v321_v39, 4  ;;  %v396_v51 = vrot.slane %v354_v40, 4  ;;  %v397_v52 = vrot.slane %v355_v41, 4  ;;  %v390_v55 = vrot.slane %v320_v43, 4  ;;  %v414_v40 = vld [vmem:[#allocation5] sm:$0xff] }
  0xd5   : > { %v327_v48 = vsel %vm326_vm5, %v323_v45, %v325_v44  ;;  %v328_v49 = vsel %vm326_vm5, %v325_v44, %v323_v45  ;;  %v234_v4 = vrot.slane %v1030_v6, %v233_v10  ;;  %v238_v21 = vrot.slane %v1032_v7, %v233_v10 }
  0xd6   : > { %v337_v53 = vmul.f32 %v332_v33, %v327_v48  ;;  %v338_v54 = vmul.f32 %v336_v42, %v328_v49  ;;  %v406_v1 = vsel %vm400_vm1, %v386_v50, %v391_v47  ;;  %v405_v3 = vsel %vm400_vm1, %v304_v34, %v390_v55 }
  0xd8   : > { %v278_v56 = vpop.permute.xlu1 %277  ;;  %v276_v57 = vpop.permute.xlu0 %275  ;;  %v408_v58 = vsel %vm400_vm1, %v338_v54, %v397_v52  ;;  %v407_v59 = vsel %vm400_vm1, %v337_v53, %v396_v51 }
  0xd9   : > { %443 = vmatprep.subr.mxu0 %v408_v58  ;;  %v280_v63 = vsel %vm279_vm6, %v276_v57, %v278_v56  ;;  %v281_v0 = vsel %vm279_vm6, %v278_v56, %v276_v57 }
  0xda   : > { %444 = vmatpush1.msra.mxu0 %v407_v59  ;;  %v290_v11 = vmul.f32 %v285_v60, %v281_v0  ;;  %v291_v12 = vmul.f32 %v289_v61, %v280_v63 }
  0xdb   : > { %445 = vmatprep.subr.mxu0 %v406_v1 }
  0xdc   : > { %v244_v5 = vpop.permute.xlu1 %243  ;;  %446 = vmatpush1.msra.mxu0 %v405_v3  ;;  %v242_v9 = vpop.permute.xlu0 %241  ;;  %v381_v22 = vrot.slane %v290_v11, 4  ;;  %v382_v23 = vrot.slane %v291_v12, 4 }
  0xdd   : > { %v246_v17 = vsel %vm245_vm7, %v242_v9, %v244_v5  ;;  %v247_v18 = vsel %vm245_vm7, %v244_v5, %v242_v9 }
  0xde   : > { %v256_v26 = vmul.f32 %v251_v13, %v247_v18  ;;  %v257_v27 = vmul.f32 %v255_v14, %v246_v17 }
  0xe0   : > { %v261_v19 = vpop.permute.xlu1 %260  ;;  %v259_v20 = vpop.permute.xlu0 %258  ;;  %v375_v34 = vrot.slane %v256_v26, 4  ;;  %v376_v35 = vrot.slane %v257_v27, 4 }
  0xe1   : > { %v263_v24 = vsel %vm262_vm8, %v259_v20, %v261_v19  ;;  %v264_v25 = vsel %vm262_vm8, %v261_v19, %v259_v20 }
  0xe2   : > { %v273_v28 = vmul.f32 %v268_v15, %v264_v25  ;;  %v274_v29 = vmul.f32 %v272_v16, %v263_v24 }
  0xe4   : > { %v225_v30 = vpop.permute.xlu1 %224  ;;  %v223_v31 = vpop.permute.xlu0 %222  ;;  %v404_v32 = vsel %vm400_vm1, %v274_v29, %v382_v23  ;;  %v403_v33 = vsel %vm400_vm1, %v273_v28, %v381_v22 }
  0xe5   : > { %v229_v6 = vsel %vm228_vm9, %v223_v31, %v225_v30  ;;  %v230_v7 = vsel %vm228_vm9, %v225_v30, %v223_v31  ;;  %447 = vmatprep.subr.mxu0 %v404_v32 }
  0xe6   : > { %v239_v36 = vmul.f32 %v234_v4, %v230_v7  ;;  %v240_v37 = vmul.f32 %v238_v21, %v229_v6  ;;  %448 = vmatpush1.msra.mxu0 %v403_v33 }
  0xe8   : > { %v402_v38 = vsel %vm400_vm1, %v240_v37, %v376_v35  ;;  %v401_v39 = vsel %vm400_vm1, %v239_v36, %v375_v34 }
  0xe9   : > { %449 = vmatprep.subr.mxu0 %v402_v38 }
  0xea   : > { %450 = vmatpush1.msra.mxu0 %v401_v39 }
  0xeb   : > { %613 = vmatmul.mubr.msk.f32.vlgmr.msra.gmra.mxu0 %vm415_vm10, %v414_v40 }
 0x1ab   : > { %v485_v8 = vpop.f32.mrf.mxu0 }
 0x1ac   : > { %490 = vst [vmem:[%s213_s9] sm:$0xff] %v485_v8 }
 0x1ad   : > { %v487_v41 = vpop.f32.mrf.mxu0 }
 0x1ae   : > { %491 = vst [vmem:[%s213_s9 + $0x8] sm:$0xff] %v487_v41 }
 0x1af   : > { %793 = shalt.err (!%p790_p12)
}
 0x1b0   : > { %s794_s27 = scalar_lea.hbm %s505_s26, 256  ;;  %s798_s28 = scalar_lea.hbm %s1141_s3, 512 }
 0x1b1   : > { %p795_p3 = scmp.ne.s32.totalorder %s505_s26, %s794_s27  ;;  %p799_p5 = scmp.lt.s32.totalorder %s505_s26, %s1141_s3 }
 0x1b2   : > { %p800_p8 = scmp.lt.s32.totalorder %s798_s28, %s794_s27 }
 0x1b3   : > { %p796_p7 = pnand %p795_p3, %p1157_p0 }
 0x1b4   : > { %p801_p11 = por %p800_p8, %p799_p5 }
 0x1b5   : > { %p797_p10 = pneg %p796_p7 }
 0x1b7   : > { %p802_p13 = pnand %p801_p11, %p797_p10 }
 0x1b9   : > { %805 = shalt.err (!%p802_p13)
}
 0x1ba   : > { %631 = dma.vmem_to_hbm [thread:$0]  (%p1157_p0), %s1098_s21, 256, %s505_s26, %s493_s30  }
 0x1bb PF: > { %s519_s6 = sand.u32 1, %s836_s12   ;;  %p1158_p1 = scmp.ne.s32.totalorder %s1147_s19, 0 }
 0x1bc   : > { %p1159_p2 = scmp.ge.s32.totalorder %s848_s15, 2  ;;  %s520_s8 = scalar_lea.sflag [#allocation4], %s519_s6 }
 0x1be   : > { %p645_p4 = pnand %p1159_p2, %p1158_p1 }
 0x1c0   : > { %p646_p6 = pneg %p645_p4 }
 0x1c2   : > { %831 = dma.done.wait (%p646_p6), %s520_s8, 256  }
 0x1c3   : > { %833 = vsyncadd (%p646_p6), %s520_s8, 4294967040  ;;  %p17_p9 = scmp.ge.s32.totalorder %s957_s7, 4   ;;  %s1160_s12 = smov %s840_s13 }
 0x1c4   : > { %s1161_s13 = smov %s844_s14  ;;  %s1162_s14 = smov %s973_s11 }
 0x1c5   : > { %s1163_s15 = smov %s957_s7  ;;  %19 = sbr.rel (!%p17_p9) target bundleno = 6 (0x6), region = 85 }
 0x1ca   :  { %525 = vsyncpa [#allocation3], 1 }
 0x1cb   :  { %527 = vsyncpa [#allocation3 + $0x1], 1 }
 0x1cc   :  { %528 = vsyncpa [#allocation6], 1 }
 0x1cd   :  { %529 = vsyncpa [#allocation4], 1 }
 0x1ce   :  { %531 = vsyncpa [#allocation4 + $0x1], 1 }

</bundles_post_ra>
